<compile_context>
chip_gen: v6e
topology: v6e:2x2x1
jax: 0.10.0
libtpu: 0.0.40
codegen_flags: <defaults>
</compile_context>

<pallas_src>
import math

import jax
import jax.numpy as jnp
from jax.experimental import pallas as pl
from jax.experimental.pallas import tpu as pltpu

HIDDEN = 1024  # fc1: img_dim -> 1024 (hardcoded in the PyTorch module)


def _round_up(x, m):
    return ((x + m - 1) // m) * m


def _encoder_image_kernel(x_ref, w1_ref, b1_ref, w2_ref, b2_ref,
                          feat_ref, feat_r_ref):
    # fc1 on the MXU with f32 accumulation; bias + relu on the VPU in f32.
    h = jnp.dot(x_ref[...], w1_ref[...], preferred_element_type=jnp.float32)
    h = jnp.maximum(h + b1_ref[...], 0.0)

    # fc2: cast activations back to the weight/compute dtype for the MXU,
    # accumulate in f32, epilogue (bias, relu) in f32.
    f = jnp.dot(h.astype(w2_ref.dtype), w2_ref[...],
                preferred_element_type=jnp.float32)
    f = f + b2_ref[...]

    feat_ref[...] = f.astype(feat_ref.dtype)
    feat_r_ref[...] = jnp.maximum(f, 0.0).astype(feat_r_ref.dtype)


def encoder_image_forward(images, w1, b1, w2, b2, *,
                          tm=256, compute_dtype=jnp.bfloat16):
    """images: [N, img_dim]; w1: [img_dim, 1024]; b1: [1024];
    w2: [1024, embed]; b2: [embed].  Returns (features, relu(features))."""
    n, img_dim = images.shape
    hidden = w1.shape[1]
    embed_size = w2.shape[1]
    out_dtype = images.dtype

    # Lane-dense padding: feature axes to multiples of 128, batch tile to a
    # multiple of 8 sublanes.
    img_dim_p = _round_up(img_dim, 128)
    hidden_p = _round_up(hidden, 128)
    embed_p = _round_up(embed_size, 128)

    tm_eff = max(8, _round_up(min(tm, _round_up(n, 8)), 8))
    n_p = _round_up(n, tm_eff)

    # Zero padding is exact: padded K rows/cols contribute 0, padded output
    # columns/rows are sliced away below.
    x_p = jnp.zeros((n_p, img_dim_p), compute_dtype)
    x_p = x_p.at[:n, :img_dim].set(images.astype(compute_dtype))
    w1_p = jnp.zeros((img_dim_p, hidden_p), compute_dtype)
    w1_p = w1_p.at[:img_dim, :hidden].set(w1.astype(compute_dtype))
    b1_p = jnp.zeros((1, hidden_p), jnp.float32)
    b1_p = b1_p.at[:, :hidden].set(b1.reshape(1, hidden).astype(jnp.float32))
    w2_p = jnp.zeros((hidden_p, embed_p), compute_dtype)
    w2_p = w2_p.at[:hidden, :embed_size].set(w2.astype(compute_dtype))
    b2_p = jnp.zeros((1, embed_p), jnp.float32)
    b2_p = b2_p.at[:, :embed_size].set(b2.reshape(1, embed_size).astype(jnp.float32))

    # Explicit VMEM budget: resident weights/biases + double-buffered x tile +
    # double-buffered output tiles + f32 intermediates, with 2x margin.
    csize = jnp.dtype(compute_dtype).itemsize
    osize = jnp.dtype(out_dtype).itemsize
    vmem_needed = (
        2 * tm_eff * img_dim_p * csize            # x tile (double buffered)
        + 2 * img_dim_p * hidden_p * csize        # w1
        + 2 * hidden_p * embed_p * csize          # w2
        + 2 * (hidden_p + embed_p) * 4            # biases (f32)
        + 2 * 2 * tm_eff * embed_p * osize        # two outputs, double buffered
        + tm_eff * hidden_p * 4                   # h (f32)
        + tm_eff * embed_p * 4                    # f (f32)
    )
    vmem_limit = int(min(max(2 * vmem_needed, 32 << 20), 100 << 20))

    grid = (pl.cdiv(n_p, tm_eff),)

    feat_p, feat_r_p = pl.pallas_call(
        _encoder_image_kernel,
        out_shape=(
            jax.ShapeDtypeStruct((n_p, embed_p), out_dtype),
            jax.ShapeDtypeStruct((n_p, embed_p), out_dtype),
        ),
        grid=grid,
        in_specs=[
            pl.BlockSpec((tm_eff, img_dim_p), lambda i: (i, 0)),   # x: tiled over N
            pl.BlockSpec((img_dim_p, hidden_p), lambda i: (0, 0)),  # w1: resident
            pl.BlockSpec((1, hidden_p), lambda i: (0, 0)),          # b1: resident
            pl.BlockSpec((hidden_p, embed_p), lambda i: (0, 0)),    # w2: resident
            pl.BlockSpec((1, embed_p), lambda i: (0, 0)),           # b2: resident
        ],
        out_specs=(
            pl.BlockSpec((tm_eff, embed_p), lambda i: (i, 0)),
            pl.BlockSpec((tm_eff, embed_p), lambda i: (i, 0)),
        ),
        compiler_params=pltpu.CompilerParams(
            dimension_semantics=("parallel",),
            vmem_limit_bytes=vmem_limit,
        ),
    )(x_p, w1_p, b1_p, w2_p, b2_p)

    return feat_p[:n, :embed_size], feat_r_p[:n, :embed_size]


def init_params(key, img_dim, embed_size):
    """Deterministic Xavier-uniform init matching EncoderImage.init_weights."""
    k1, k2 = jax.random.split(key)
    r1 = math.sqrt(6.0) / math.sqrt(img_dim + HIDDEN)
    r2 = math.sqrt(6.0) / math.sqrt(HIDDEN + embed_size)
    # Stored already-transposed relative to torch's [out, in] layout.
    w1 = jax.random.uniform(k1, (img_dim, HIDDEN), jnp.float32, minval=-r1, maxval=r1)
    b1 = jnp.zeros((HIDDEN,), jnp.float32)
    w2 = jax.random.uniform(k2, (HIDDEN, embed_size), jnp.float32, minval=-r2, maxval=r2)
    b2 = jnp.zeros((embed_size,), jnp.float32)
    return w1, b1, w2, b2


if __name__ == "__main__":
    key = jax.random.PRNGKey(0)
    kx, kp = jax.random.split(key)

    batch = 8
    img_dim = 32
    embed_size = 32

    images = jax.random.normal(kx, (batch, img_dim), jnp.float32)
    w1, b1, w2, b2 = init_params(kp, img_dim, embed_size)

    features, features_r = encoder_image_forward(
        images, w1, b1, w2, b2, tm=256, compute_dtype=jnp.bfloat16)
    jax.block_until_ready((features, features_r))

    # Reference check in plain JAX with the same bf16 operand casts
    # (accumulation still f32, so only summation order differs).
    xb = images.astype(jnp.bfloat16).astype(jnp.float32)
    w1b = w1.astype(jnp.bfloat16).astype(jnp.float32)
    w2b = w2.astype(jnp.bfloat16).astype(jnp.float32)
    h_ref = jnp.maximum(xb @ w1b + b1.reshape(1, -1), 0.0)
    f_ref = h_ref.astype(jnp.bfloat16).astype(jnp.float32) @ w2b + b2.reshape(1, -1)

    assert features.shape == (batch, embed_size)
    assert features_r.shape == (batch, embed_size)
    assert jnp.allclose(features, f_ref, atol=5e-3, rtol=5e-3)
    assert jnp.allclose(features_r, jnp.maximum(f_ref, 0.0), atol=5e-3, rtol=5e-3)

    print("KERNEL_OK")
</pallas_src>

<mosaic_0001>
module attributes {stable_mosaic.version = 11 : i64} {
  func.func @_encoder_image_kernel(%arg0: i32, %arg1: memref<8x128xbf16, #tpu.memory_space<vmem>>, %arg2: memref<128x1024xbf16, #tpu.memory_space<vmem>>, %arg3: memref<1x1024xf32, #tpu.memory_space<vmem>>, %arg4: memref<1024x128xbf16, #tpu.memory_space<vmem>>, %arg5: memref<1x128xf32, #tpu.memory_space<vmem>>, %arg6: memref<8x128xf32, #tpu.memory_space<vmem>>, %arg7: memref<8x128xf32, #tpu.memory_space<vmem>>) attributes {dimension_semantics = [#tpu.dimension_semantics<parallel>], iteration_bounds = array<i64: 1>, scalar_prefetch = 0 : i64, scratch_operands = 0 : i64, tpu.core_type = #tpu.core_type<tc>, window_params = [{transform_indices = @transform_0, window_bounds = array<i64: 8, 128>}, {pipeline_mode = #tpu.pipeline_mode<synchronous>, transform_indices = @transform_1, window_bounds = array<i64: 128, 1024>}, {pipeline_mode = #tpu.pipeline_mode<synchronous>, transform_indices = @transform_2, window_bounds = array<i64: 1, 1024>}, {pipeline_mode = #tpu.pipeline_mode<synchronous>, transform_indices = @transform_3, window_bounds = array<i64: 1024, 128>}, {pipeline_mode = #tpu.pipeline_mode<synchronous>, transform_indices = @transform_4, window_bounds = array<i64: 1, 128>}, {transform_indices = @transform_5, window_bounds = array<i64: 8, 128>}, {transform_indices = @transform_6, window_bounds = array<i64: 8, 128>}]} {
    %c0 = arith.constant 0 : index
    %c0_0 = arith.constant 0 : index
    %0 = vector.load %arg1[%c0, %c0_0] : memref<8x128xbf16, #tpu.memory_space<vmem>>, vector<8x128xbf16>
    %c0_1 = arith.constant 0 : index
    %c0_2 = arith.constant 0 : index
    %1 = vector.load %arg2[%c0_1, %c0_2] : memref<128x1024xbf16, #tpu.memory_space<vmem>>, vector<128x1024xbf16>
    %cst = arith.constant dense<0.000000e+00> : vector<8x1024xf32>
    %2 = tpu.matmul %0, %1, %cst {dimension_numbers = #tpu.dot_dimension_numbers<[1], [0], [0], [1], [0, 0, 1, 1], [], []>} : vector<8x128xbf16>, vector<128x1024xbf16>, vector<8x1024xf32> -> vector<8x1024xf32>
    %c0_3 = arith.constant 0 : index
    %c0_4 = arith.constant 0 : index
    %3 = vector.load %arg3[%c0_3, %c0_4] : memref<1x1024xf32, #tpu.memory_space<vmem>>, vector<1x1024xf32>
    %4 = vector.broadcast %3 : vector<1x1024xf32> to vector<8x1024xf32>
    %5 = arith.addf %2, %4 : vector<8x1024xf32>
    %cst_5 = arith.constant 0.000000e+00 : f32
    %6 = vector.broadcast %cst_5 : f32 to vector<8x1024xf32>
    %7 = arith.maximumf %5, %6 : vector<8x1024xf32>
    %8 = arith.truncf %7 : vector<8x1024xf32> to vector<8x1024xbf16>
    %c0_6 = arith.constant 0 : index
    %c0_7 = arith.constant 0 : index
    %9 = vector.load %arg4[%c0_6, %c0_7] : memref<1024x128xbf16, #tpu.memory_space<vmem>>, vector<1024x128xbf16>
    %cst_8 = arith.constant dense<0.000000e+00> : vector<8x128xf32>
    %10 = tpu.matmul %8, %9, %cst_8 {dimension_numbers = #tpu.dot_dimension_numbers<[1], [0], [0], [1], [0, 0, 1, 1], [], []>} : vector<8x1024xbf16>, vector<1024x128xbf16>, vector<8x128xf32> -> vector<8x128xf32>
    %c0_9 = arith.constant 0 : index
    %c0_10 = arith.constant 0 : index
    %11 = vector.load %arg5[%c0_9, %c0_10] : memref<1x128xf32, #tpu.memory_space<vmem>>, vector<1x128xf32>
    %12 = vector.broadcast %11 : vector<1x128xf32> to vector<8x128xf32>
    %13 = arith.addf %10, %12 : vector<8x128xf32>
    %c0_11 = arith.constant 0 : index
    %c0_12 = arith.constant 0 : index
    %14 = vector.load %arg6[%c0_11, %c0_12] : memref<8x128xf32, #tpu.memory_space<vmem>>, vector<8x128xf32>
    tpu.vector_store %arg6[%c0_11, %c0_12], %13 {strides = array<i32>} : memref<8x128xf32, #tpu.memory_space<vmem>>, vector<8x128xf32>,
    %cst_13 = arith.constant 0.000000e+00 : f32
    %15 = vector.broadcast %cst_13 : f32 to vector<8x128xf32>
    %16 = arith.maximumf %13, %15 : vector<8x128xf32>
    %c0_14 = arith.constant 0 : index
    %c0_15 = arith.constant 0 : index
    %17 = vector.load %arg7[%c0_14, %c0_15] : memref<8x128xf32, #tpu.memory_space<vmem>>, vector<8x128xf32>
    tpu.vector_store %arg7[%c0_14, %c0_15], %16 {strides = array<i32>} : memref<8x128xf32, #tpu.memory_space<vmem>>, vector<8x128xf32>,
    return
  }
  func.func @transform_0(%arg0: i32) -> (i32, i32) {
    %c0_i32 = arith.constant 0 : i32
    %c0_i32_0 = arith.constant 0 : i32
    return %arg0, %c0_i32 : i32, i32
  }
  func.func @transform_1(%arg0: i32) -> (i32, i32) {
    %c0_i32 = arith.constant 0 : i32
    %c0_i32_0 = arith.constant 0 : i32
    %c0_i32_1 = arith.constant 0 : i32
    return %c0_i32, %c0_i32_0 : i32, i32
  }
  func.func @transform_2(%arg0: i32) -> (i32, i32) {
    %c0_i32 = arith.constant 0 : i32
    %c0_i32_0 = arith.constant 0 : i32
    %c0_i32_1 = arith.constant 0 : i32
    return %c0_i32, %c0_i32_0 : i32, i32
  }
  func.func @transform_3(%arg0: i32) -> (i32, i32) {
    %c0_i32 = arith.constant 0 : i32
    %c0_i32_0 = arith.constant 0 : i32
    %c0_i32_1 = arith.constant 0 : i32
    return %c0_i32, %c0_i32_0 : i32, i32
  }
  func.func @transform_4(%arg0: i32) -> (i32, i32) {
    %c0_i32 = arith.constant 0 : i32
    %c0_i32_0 = arith.constant 0 : i32
    %c0_i32_1 = arith.constant 0 : i32
    return %c0_i32, %c0_i32_0 : i32, i32
  }
  func.func @transform_5(%arg0: i32) -> (i32, i32) {
    %c0_i32 = arith.constant 0 : i32
    %c0_i32_0 = arith.constant 0 : i32
    return %arg0, %c0_i32 : i32, i32
  }
  func.func @transform_6(%arg0: i32) -> (i32, i32) {
    %c0_i32 = arith.constant 0 : i32
    %c0_i32_0 = arith.constant 0 : i32
    return %arg0, %c0_i32 : i32, i32
  }
}

</mosaic_0001>

<bundles_post_ra>
// kernel: tpu_custom_call.1
= control target key start
LH: loop header
LB: loop body
LE: loop exit
PB: predicated region body
PF: predicated region fallthrough
CT: control target
= control target key end

     0   :  { %12 = vsyncpa [#allocation3], 0  ;;  %s1915_s0 = inlined_call_operand.hbm [shape: bf16[8,128], index: 0, kind: input, shape index: {}]   ;;  %s1916_s1 = inlined_call_operand.hbm [shape: bf16[128,1024], index: 1, kind: input, shape index: {}]   ;;  %s1917_s2 = inlined_call_operand.hbm [shape: f32[1,1024], index: 2, kind: input, shape index: {}]   ;;  %s1918_s3 = inlined_call_operand.hbm [shape: bf16[1024,128], index: 3, kind: input, shape index: {}]   ;;  %s1919_s4 = inlined_call_operand.vmem [shape: f32[1,128], index: 4, kind: input, shape index: {}]   ;;  %s1920_s5 = inlined_call_operand.hbm [shape: f32[8,128], index: 5, kind: output, shape index: {0}]   ;;  %s1921_s6 = inlined_call_operand.hbm [shape: f32[8,128], index: 6, kind: output, shape index: {1}]  }
   0x1   :  { %13 = vsyncpa [#allocation6], 0 }
   0x2   :  { %14 = vsyncpa [#allocation9], 0 }
   0x3   :  { %15 = vsyncpa [#allocation4], 0 }
   0x4   :  { %16 = vsyncpa [#allocation12], 0  ;;  %s1818_s21 = smov [#allocation5]  }
   0x5   :  { %s32_s22 = sshll.u32 %s1818_s21, 4  ;;  %s33_s22 = int_to_ptr.vmem [resolvable:$true] %s32_s22 }
   0x6   :  { %s1696_s23 = scalar_lea.vmem %s33_s22, 8192  ;;  %p1701_p1 = scmp.lt.s32.totalorder %s33_s22, %s33_s22 }
   0x7   :  { %p1697_p0 = scmp.ne.s32.totalorder %s33_s22, %s1696_s23  ;;  %p1702_p2 = scmp.lt.s32.totalorder %s1696_s23, %s1696_s23 }
   0x9   :  { %p1703_p3 = por %p1702_p2, %p1701_p1 }
   0xb   :  { %p1704_p4 = pnand %p1703_p3, %p1697_p0 }
   0xd   :  { %1707 = shalt.err (!%p1704_p4)
}
   0xe   :  { %s1819_s24 = smov 512   ;;  %s1820_s25 = smov 32  }
   0xf   :  { %38 = dma.hbm_to_vmem [thread:$0]  %s1916_s1, 8192, %s33_s22, [#allocation6], %s1819_s24, %s1819_s24, %s1820_s25  }
  0x10   :  { %s1821_s28 = smov [#allocation2]   ;;  %s1822_s30 = smov [#allocation7]  }
  0x11   :  { %s23_s29 = sshll.u32 %s1821_s28, 4  ;;  %s45_s7 = sshll.u32 %s1822_s30, 4  ;;  %s24_s29 = int_to_ptr.vmem [resolvable:$true] %s23_s29  ;;  %s46_s7 = int_to_ptr.vmem [resolvable:$true] %s45_s7 }
  0x12   :  { %s1716_s8 = scalar_lea.vmem %s24_s29, 64  ;;  %p1721_p6 = scmp.lt.s32.totalorder %s24_s29, %s24_s29 }
  0x13   :  { %p1717_p5 = scmp.ne.s32.totalorder %s24_s29, %s1716_s8  ;;  %p1722_p7 = scmp.lt.s32.totalorder %s1716_s8, %s1716_s8 }
  0x15   :  { %p1723_p8 = por %p1722_p7, %p1721_p6 }
  0x17   :  { %p1724_p9 = pnand %p1723_p8, %p1717_p5 }
  0x19   :  { %1727 = shalt.err (!%p1724_p9)
}
  0x1a   :  { %26 = dma.hbm_to_vmem [thread:$0]  %s1915_s0, 64, %s24_s29, [#allocation3]  }
  0x1b   :  { %s1736_s11 = scalar_lea.vmem %s46_s7, 128  ;;  %p1741_p11 = scmp.lt.s32.totalorder %s46_s7, %s46_s7 }
  0x1c   :  { %p1737_p10 = scmp.ne.s32.totalorder %s46_s7, %s1736_s11  ;;  %p1742_p12 = scmp.lt.s32.totalorder %s1736_s11, %s1736_s11 }
  0x1e   :  { %p1743_p13 = por %p1742_p12, %p1741_p11 }
  0x20   :  { %p1744_p0 = pnand %p1743_p13, %p1737_p10 }
  0x22   :  { %1747 = shalt.err (!%p1744_p0)
}
  0x23   :  { %48 = dma.hbm_to_vmem [thread:$0]  %s1917_s2, 128, %s46_s7, [#allocation6]  }
  0x24   :  { %s1823_s13 = smov [#allocation8]  }
  0x25   :  { %s54_s14 = sshll.u32 %s1823_s13, 4  ;;  %s55_s14 = int_to_ptr.vmem [resolvable:$true] %s54_s14 }
  0x26   :  { %s1756_s15 = scalar_lea.vmem %s55_s14, 8192  ;;  %p1761_p2 = scmp.lt.s32.totalorder %s55_s14, %s55_s14 }
  0x27   :  { %p1757_p1 = scmp.ne.s32.totalorder %s55_s14, %s1756_s15  ;;  %p1762_p3 = scmp.lt.s32.totalorder %s1756_s15, %s1756_s15 }
  0x29   :  { %p1763_p4 = por %p1762_p3, %p1761_p2 }
  0x2b   :  { %p1764_p5 = pnand %p1763_p4, %p1757_p1 }
  0x2d   :  { %1767 = shalt.err (!%p1764_p5)
}
  0x2e   :  { %s1824_s0 = smov 64   ;;  %s1825_s16 = smov 4  }
  0x2f   :  { %60 = dma.hbm_to_vmem [thread:$0]  %s1918_s3, 8192, %s55_s14, [#allocation9], %s1824_s0, %s1824_s0, %s1825_s16  }
  0x30   :  { %1808 = dma.done.wait [#allocation3], 64  }
  0x31   :  { %1809 = vsyncadd [#allocation3], 4294967232 }
  0x32   :  { %1810 = dma.done.wait [#allocation6], 8320  }
  0x33   :  { %1811 = vsyncadd [#allocation6], 4294958976 }
  0x34   :  { %1812 = dma.done.wait [#allocation9], 8192  }
  0x35   :  { %1813 = vsyncadd [#allocation9], 4294959104  ;;  %v1826_v0 = vmov 0   ;;  %v133_v1 = vld [vmem:[#allocation5 + $0x1c0] sm:$0xff]  ;;  %v134_v3 = vld [vmem:[#allocation5 + $0x1c8] sm:$0xff]  ;;  %s1827_s19 = smov [#allocation10]  }
  0x36   :  { %535 = vmatprep.mubr.bf16.mxu0 %v1826_v0  ;;  %576 = vmatprep.mubr.bf16.mxu1 %v1826_v0  ;;  %v137_v2 = vld [vmem:[#allocation5 + $0x1e0] sm:$0xff]  ;;  %v138_v5 = vld [vmem:[#allocation5 + $0x1e8] sm:$0xff]  ;;  %v135_v60 = vld [vmem:[#allocation5 + $0x1d0] sm:$0xff]  ;;  %s1371_s20 = sshll.u32 %s1827_s19, 4  ;;  %s1828_s21 = smov [#allocation11]   ;;  %s1372_s20 = int_to_ptr.vmem [resolvable:$true] %s1371_s20 }
  0x37   :  { %v1453_v4 = vcombine.high %v133_v1, %v137_v2  ;;  %v1452_v6 = vcombine.low %v133_v1, %v137_v2  ;;  %v125_v7 = vld [vmem:[#allocation5 + $0x180] sm:$0xff]  ;;  %v1455_v9 = vcombine.high %v134_v3, %v138_v5  ;;  %v1454_v10 = vcombine.low %v134_v3, %v138_v5  ;;  %v126_v12 = vld [vmem:[#allocation5 + $0x188] sm:$0xff]  ;;  %v139_v63 = vld [vmem:[#allocation5 + $0x1f0] sm:$0xff]  ;;  %s1381_s22 = sshll.u32 %s1828_s21, 4  ;;  %p1773_p7 = scmp.lt.s32.totalorder %s1372_s20, %s1372_s20  ;;  %s1382_s22 = int_to_ptr.vmem [resolvable:$true] %s1381_s22 }
  0x38   :  { %v129_v8 = vld [vmem:[#allocation5 + $0x1a0] sm:$0xff]  ;;  %v130_v13 = vld [vmem:[#allocation5 + $0x1a8] sm:$0xff]  ;;  %v136_v2 = vld [vmem:[#allocation5 + $0x1d8] sm:$0xff] }
  0x39   :  { %v1445_v11 = vcombine.high %v125_v7, %v129_v8  ;;  %v117_v14 = vld [vmem:[#allocation5 + $0x140] sm:$0xff]  ;;  %503 = vmatprep.subr.bf16.mxu0 %v1453_v4  ;;  %v1447_v15 = vcombine.high %v126_v12, %v130_v13  ;;  %v118_v17 = vld [vmem:[#allocation5 + $0x148] sm:$0xff]  ;;  %544 = vmatprep.subr.bf16.mxu1 %v1455_v9  ;;  %v1444_v19 = vcombine.low %v125_v7, %v129_v8  ;;  %v140_v3 = vld [vmem:[#allocation5 + $0x1f8] sm:$0xff] }
  0x3a   :  { %v121_v16 = vld [vmem:[#allocation5 + $0x160] sm:$0xff]  ;;  %v122_v18 = vld [vmem:[#allocation5 + $0x168] sm:$0xff]  ;;  %504 = vmatpush1.bf16.msra.mxu0 %v1452_v6  ;;  %545 = vmatpush1.bf16.msra.mxu1 %v1454_v10  ;;  %v1446_v20 = vcombine.low %v126_v12, %v130_v13  ;;  %v127_v5 = vld [vmem:[#allocation5 + $0x190] sm:$0xff]  ;;  %v1457_v7 = vcombine.high %v135_v60, %v139_v63  ;;  %v1459_v10 = vcombine.high %v136_v2, %v140_v3 }
  0x3b   :  { %505 = vmatprep.subr.bf16.mxu0 %v1445_v11  ;;  %v1437_v21 = vcombine.high %v117_v14, %v121_v16  ;;  %546 = vmatprep.subr.bf16.mxu1 %v1447_v15  ;;  %v1439_v22 = vcombine.high %v118_v17, %v122_v18  ;;  %v109_v23 = vld [vmem:[#allocation5 + $0x100] sm:$0xff]  ;;  %v110_v25 = vld [vmem:[#allocation5 + $0x108] sm:$0xff]  ;;  %v1436_v27 = vcombine.low %v117_v14, %v121_v16  ;;  %v131_v8 = vld [vmem:[#allocation5 + $0x1b0] sm:$0xff] }
  0x3c   :  { %v113_v24 = vld [vmem:[#allocation5 + $0x120] sm:$0xff]  ;;  %v114_v26 = vld [vmem:[#allocation5 + $0x128] sm:$0xff]  ;;  %v1438_v28 = vcombine.low %v118_v17, %v122_v18  ;;  %v1878_v9 = vld [vmem:[#allocation2] sm:$0xf]  ;;  %v1456_v13 = vcombine.low %v135_v60, %v139_v63  ;;  %v1458_v15 = vcombine.low %v136_v2, %v140_v3  ;;  %v1449_v16 = vcombine.high %v127_v5, %v131_v8 }
  0x3d   :  { %v1429_v29 = vcombine.high %v109_v23, %v113_v24  ;;  %v1431_v30 = vcombine.high %v110_v25, %v114_v26  ;;  %v101_v31 = vld [vmem:[#allocation5 + $0xc0] sm:$0xff]  ;;  %v102_v33 = vld [vmem:[#allocation5 + $0xc8] sm:$0xff]  ;;  %v1428_v35 = vcombine.low %v109_v23, %v113_v24  ;;  %v1430_v36 = vcombine.low %v110_v25, %v114_v26  ;;  %v128_v11 = vld [vmem:[#allocation5 + $0x198] sm:$0xff] }
  0x3e   :  { %506 = vmatpush1.bf16.msra.mxu0 %v1444_v19  ;;  %547 = vmatpush1.bf16.msra.mxu1 %v1446_v20  ;;  %v105_v32 = vld [vmem:[#allocation5 + $0xe0] sm:$0xff]  ;;  %v106_v34 = vld [vmem:[#allocation5 + $0xe8] sm:$0xff]  ;;  %v132_v12 = vld [vmem:[#allocation5 + $0x1b8] sm:$0xff] }
  0x3f   :  { %507 = vmatprep.subr.bf16.mxu0 %v1437_v21  ;;  %548 = vmatprep.subr.bf16.mxu1 %v1439_v22  ;;  %v1421_v37 = vcombine.high %v101_v31, %v105_v32  ;;  %v1423_v38 = vcombine.high %v102_v33, %v106_v34  ;;  %v93_v39 = vld [vmem:[#allocation5 + $0x80] sm:$0xff]  ;;  %v94_v41 = vld [vmem:[#allocation5 + $0x88] sm:$0xff]  ;;  %v1420_v43 = vcombine.low %v101_v31, %v105_v32  ;;  %v119_v14 = vld [vmem:[#allocation5 + $0x150] sm:$0xff] }
  0x40   :  { %v97_v40 = vld [vmem:[#allocation5 + $0xa0] sm:$0xff]  ;;  %v98_v42 = vld [vmem:[#allocation5 + $0xa8] sm:$0xff]  ;;  %v1422_v44 = vcombine.low %v102_v33, %v106_v34  ;;  %v123_v17 = vld [vmem:[#allocation5 + $0x170] sm:$0xff]  ;;  %v1451_v18 = vcombine.high %v128_v11, %v132_v12  ;;  %v1448_v21 = vcombine.low %v127_v5, %v131_v8  ;;  %v1450_v23 = vcombine.low %v128_v11, %v132_v12 }
  0x41   :  { %v1413_v45 = vcombine.high %v93_v39, %v97_v40  ;;  %v1415_v46 = vcombine.high %v94_v41, %v98_v42  ;;  %v85_v47 = vld [vmem:[#allocation5 + $0x40] sm:$0xff]  ;;  %v86_v49 = vld [vmem:[#allocation5 + $0x48] sm:$0xff]  ;;  %v1412_v51 = vcombine.low %v93_v39, %v97_v40  ;;  %v1414_v52 = vcombine.low %v94_v41, %v98_v42  ;;  %v120_v19 = vld [vmem:[#allocation5 + $0x158] sm:$0xff] }
  0x42   :  { %508 = vmatpush1.bf16.msra.mxu0 %v1436_v27  ;;  %549 = vmatpush1.bf16.msra.mxu1 %v1438_v28  ;;  %v89_v48 = vld [vmem:[#allocation5 + $0x60] sm:$0xff]  ;;  %v90_v50 = vld [vmem:[#allocation5 + $0x68] sm:$0xff]  ;;  %v124_v20 = vld [vmem:[#allocation5 + $0x178] sm:$0xff]  ;;  %v1441_v24 = vcombine.high %v119_v14, %v123_v17 }
  0x43   :  { %509 = vmatprep.subr.bf16.mxu0 %v1429_v29  ;;  %550 = vmatprep.subr.bf16.mxu1 %v1431_v30  ;;  %v1405_v53 = vcombine.high %v85_v47, %v89_v48  ;;  %v77_v54 = vld [vmem:[#allocation5] sm:$0xff]  ;;  %v1407_v56 = vcombine.high %v86_v49, %v90_v50  ;;  %v78_v57 = vld [vmem:[#allocation5 + $0x8] sm:$0xff]  ;;  %v1404_v59 = vcombine.low %v85_v47, %v89_v48  ;;  %v111_v22 = vld [vmem:[#allocation5 + $0x110] sm:$0xff] }
  0x44   :  { %v81_v55 = vld [vmem:[#allocation5 + $0x20] sm:$0xff]  ;;  %v82_v58 = vld [vmem:[#allocation5 + $0x28] sm:$0xff]  ;;  %v1406_v61 = vcombine.low %v86_v49, %v90_v50  ;;  %v115_v25 = vld [vmem:[#allocation5 + $0x130] sm:$0xff]  ;;  %v1443_v26 = vcombine.high %v120_v19, %v124_v20  ;;  %v1440_v29 = vcombine.low %v119_v14, %v123_v17  ;;  %v1442_v31 = vcombine.low %v120_v19, %v124_v20 }
  0x45   :  { %v1397_v62 = vcombine.high %v77_v54, %v81_v55  ;;  %v1399_v1 = vcombine.high %v78_v57, %v82_v58  ;;  %v1396_v4 = vcombine.low %v77_v54, %v81_v55  ;;  %v1398_v6 = vcombine.low %v78_v57, %v82_v58  ;;  %v112_v27 = vld [vmem:[#allocation5 + $0x118] sm:$0xff]  ;;  %v103_v30 = vld [vmem:[#allocation5 + $0xd0] sm:$0xff]  ;;  %v1625_v3 = vld [vmem:[#allocation8 + $0xf8] sm:$0xff]  }
  0x46   :  { %510 = vmatpush1.bf16.msra.mxu0 %v1428_v35  ;;  %551 = vmatpush1.bf16.msra.mxu1 %v1430_v36  ;;  %v116_v28 = vld [vmem:[#allocation5 + $0x138] sm:$0xff]  ;;  %v1433_v32 = vcombine.high %v111_v22, %v115_v25  ;;  %v107_v33 = vld [vmem:[#allocation5 + $0xf0] sm:$0xff]  ;;  %v1626_v5 = vld [vmem:[#allocation8 + $0x38] sm:$0xff]  }
  0x47   :  { %511 = vmatprep.subr.bf16.mxu0 %v1421_v37  ;;  %552 = vmatprep.subr.bf16.mxu1 %v1423_v38  ;;  %v1435_v34 = vcombine.high %v112_v27, %v116_v28  ;;  %v104_v35 = vld [vmem:[#allocation5 + $0xd8] sm:$0xff]  ;;  %v1432_v37 = vcombine.low %v111_v22, %v115_v25  ;;  %v95_v38 = vld [vmem:[#allocation5 + $0x90] sm:$0xff]  ;;  %v1434_v40 = vcombine.low %v112_v27, %v116_v28  ;;  %v1637_v17 = vld [vmem:[#allocation8 + $0xe0] sm:$0xff]  }
  0x48   :  { %v108_v36 = vld [vmem:[#allocation5 + $0xf8] sm:$0xff]  ;;  %v99_v39 = vld [vmem:[#allocation5 + $0xb0] sm:$0xff]  ;;  %v1639_v19 = vld [vmem:[#allocation8 + $0xa0] sm:$0xff]  }
  0x49   :  { %v96_v41 = vld [vmem:[#allocation5 + $0x98] sm:$0xff]  ;;  %v1426_v47 = vcombine.low %v104_v35, %v108_v36  ;;  %v1417_v48 = vcombine.high %v95_v38, %v99_v39  ;;  %v83_v54 = vld [vmem:[#allocation5 + $0x30] sm:$0xff]  ;;  %v1640_v20 = vld [vmem:[#allocation8 + $0x58] sm:$0xff]  }
  0x4a   :  { %512 = vmatpush1.bf16.msra.mxu0 %v1420_v43  ;;  %553 = vmatpush1.bf16.msra.mxu1 %v1422_v44  ;;  %v100_v42 = vld [vmem:[#allocation5 + $0xb8] sm:$0xff]  ;;  %v1427_v43 = vcombine.high %v104_v35, %v108_v36  ;;  %v1424_v44 = vcombine.low %v103_v30, %v107_v33  ;;  %v1632_v12 = vld [vmem:[#allocation8 + $0x68] sm:$0xff]   ;;  %v1643_v22 = vld [vmem:[#allocation8 + $0x98] sm:$0xff]  }
  0x4b   :  { %513 = vmatprep.subr.bf16.mxu0 %v1413_v45  ;;  %554 = vmatprep.subr.bf16.mxu1 %v1415_v46  ;;  %v87_v45 = vld [vmem:[#allocation5 + $0x50] sm:$0xff]  ;;  %v88_v49 = vld [vmem:[#allocation5 + $0x58] sm:$0xff]  ;;  %v1418_v55 = vcombine.low %v96_v41, %v100_v42  ;;  %v1656_v35 = vld [vmem:[#allocation8 + $0x178] sm:$0xff]  }
  0x4c   :  { %v91_v46 = vld [vmem:[#allocation5 + $0x70] sm:$0xff]  ;;  %v92_v50 = vld [vmem:[#allocation5 + $0x78] sm:$0xff]  ;;  %v1657_v36 = vld [vmem:[#allocation8 + $0x1f8] sm:$0xff]  }
  0x4d   :  { %v80_v57 = vld [vmem:[#allocation5 + $0x18] sm:$0xff]  ;;  %v1408_v60 = vcombine.low %v87_v45, %v91_v46  ;;  %v1634_v14 = vld [vmem:[#allocation8 + $0x28] sm:$0xff]  }
  0x4e   :  { %514 = vmatpush1.bf16.msra.mxu0 %v1412_v51  ;;  %555 = vmatpush1.bf16.msra.mxu1 %v1414_v52  ;;  %v1419_v51 = vcombine.high %v96_v41, %v100_v42  ;;  %v1416_v52 = vcombine.low %v95_v38, %v99_v39  ;;  %v84_v58 = vld [vmem:[#allocation5 + $0x38] sm:$0xff]  ;;  %v1648_v27 = vld [vmem:[#allocation8 + $0x48] sm:$0xff]  }
  0x4f   :  { %515 = vmatprep.subr.bf16.mxu0 %v1405_v53  ;;  %556 = vmatprep.subr.bf16.mxu1 %v1407_v56  ;;  %v79_v53 = vld [vmem:[#allocation5 + $0x10] sm:$0xff]  ;;  %v1409_v56 = vcombine.high %v87_v45, %v91_v46  ;;  %v1403_v63 = vcombine.high %v80_v57, %v84_v58  ;;  %v1629_v8 = vld [vmem:[#allocation8 + $0xf0] sm:$0xff]  }
  0x50   :  { %v1400_v2 = vcombine.low %v79_v53, %v83_v54  ;;  %v1631_v11 = vld [vmem:[#allocation8 + $0xb0] sm:$0xff]   ;;  %v1649_v28 = vld [vmem:[#allocation8 + $0xc8] sm:$0xff]  }
  0x51   :  { %v1646_v25 = vld [vmem:[#allocation8 + $0x10] sm:$0xff]  }
  0x52   :  { %516 = vmatpush1.bf16.msra.mxu0 %v1404_v59  ;;  %557 = vmatpush1.bf16.msra.mxu1 %v1406_v61  ;;  %v1411_v59 = vcombine.high %v88_v49, %v92_v50  ;;  %v1410_v61 = vcombine.low %v88_v49, %v92_v50 }
  0x53   :  { %517 = vmatprep.subr.bf16.mxu0 %v1397_v62  ;;  %558 = vmatprep.subr.bf16.mxu1 %v1399_v1  ;;  %v1401_v62 = vcombine.high %v79_v53, %v83_v54  ;;  %v1624_v1 = vld [vmem:[#allocation8 + $0x78] sm:$0xff]  }
  0x56   :  { %518 = vmatpush1.bf16.msra.mxu0 %v1396_v4  ;;  %559 = vmatpush1.bf16.msra.mxu1 %v1398_v6  ;;  %v1402_v4 = vcombine.low %v80_v57, %v84_v58  ;;  %v1627_v6 = vld [vmem:[#allocation8 + $0xb8] sm:$0xff]  }
  0x57   :  { %585 = vmatprep.subr.bf16.mxu0 %v1457_v7  ;;  %626 = vmatprep.subr.bf16.mxu1 %v1459_v10  ;;  %v1628_v7 = vld [vmem:[#allocation8 + $0x70] sm:$0xff]  }
  0x58   :  { %v1630_v10 = vld [vmem:[#allocation8 + $0x30] sm:$0xff]  }
  0x59   :  { %536 = vmatmul.mubr.bf16.vlgmr.msra.gmra.mxu0 %v1878_v9  ;;  %577 = vmatmul.mubr.bf16.vlgmr.msra.gmra.mxu1 %v1878_v9 }
  0x5a   :  { %586 = vmatpush1.bf16.msra.mxu0 %v1456_v13  ;;  %627 = vmatpush1.bf16.msra.mxu1 %v1458_v15  ;;  %v1633_v13 = vld [vmem:[#allocation8 + $0xe8] sm:$0xff]  }
  0x5b   :  { %587 = vmatprep.subr.bf16.mxu0 %v1449_v16  ;;  %628 = vmatprep.subr.bf16.mxu1 %v1451_v18  ;;  %v1635_v15 = vld [vmem:[#allocation8 + $0xa8] sm:$0xff]   ;;  %v1636_v16 = vld [vmem:[#allocation8 + $0x60] sm:$0xff]  }
  0x5c   :  { %617 = vmatprep.mubr.bf16.mxu0 %v1826_v0  ;;  %658 = vmatprep.mubr.bf16.mxu1 %v1826_v0  ;;  %v1425_v0 = vcombine.high %v103_v30, %v107_v33  ;;  %v1638_v18 = vld [vmem:[#allocation8 + $0x20] sm:$0xff]   ;;  %v1651_v30 = vld [vmem:[#allocation8 + $0x88] sm:$0xff]  }
  0x5d   :  { %v1654_v33 = vld [vmem:[#allocation8] sm:$0xff]  }
  0x5e   :  { %588 = vmatpush1.bf16.msra.mxu0 %v1448_v21  ;;  %629 = vmatpush1.bf16.msra.mxu1 %v1450_v23  ;;  %v1642_v21 = vld [vmem:[#allocation8 + $0x18] sm:$0xff]   ;;  %v1644_v23 = vld [vmem:[#allocation8 + $0x50] sm:$0xff]  }
  0x5f   :  { %589 = vmatprep.subr.bf16.mxu0 %v1441_v24  ;;  %630 = vmatprep.subr.bf16.mxu1 %v1443_v26  ;;  %v1645_v24 = vld [vmem:[#allocation8 + $0xd0] sm:$0xff]  }
  0x60   :  { %v1647_v26 = vld [vmem:[#allocation8 + $0x90] sm:$0xff]  }
  0x62   :  { %590 = vmatpush1.bf16.msra.mxu0 %v1440_v29  ;;  %631 = vmatpush1.bf16.msra.mxu1 %v1442_v31  ;;  %v1650_v29 = vld [vmem:[#allocation8 + $0x8] sm:$0xff]   ;;  %v1652_v31 = vld [vmem:[#allocation8 + $0x40] sm:$0xff]  }
  0x63   :  { %591 = vmatprep.subr.bf16.mxu0 %v1433_v32  ;;  %632 = vmatprep.subr.bf16.mxu1 %v1435_v34  ;;  %v1653_v32 = vld [vmem:[#allocation8 + $0xc0] sm:$0xff]  }
  0x64   :  { %v1655_v34 = vld [vmem:[#allocation8 + $0x80] sm:$0xff]  }
  0x66   :  { %592 = vmatpush1.bf16.msra.mxu0 %v1432_v37  ;;  %633 = vmatpush1.bf16.msra.mxu1 %v1434_v40  ;;  %v143_v37 = vlaneseq  ;;  %v1889_v40 = vld [vmem:[#allocation7] sm:$0xff] }
  0x67   :  { %593 = vmatprep.subr.bf16.mxu0 %v1425_v0  ;;  %634 = vmatprep.subr.bf16.mxu1 %v1427_v43 }
  0x68   :  { %v1886_v38 = vshrl.u32 %v143_v37, 7 }
  0x6a   :  { %594 = vmatpush1.bf16.msra.mxu0 %v1424_v44  ;;  %635 = vmatpush1.bf16.msra.mxu1 %v1426_v47  ;;  %v145_v39 = vsub.s32 0, %v1886_v38  ;;  %v153_v0 = vsub.s32 2, %v1886_v38  ;;  %v149_v41 = vsub.s32 1, %v1886_v38  ;;  %v157_v42 = vsub.s32 3, %v1886_v38 }
  0x6b   :  { %595 = vmatprep.subr.bf16.mxu0 %v1417_v48  ;;  %636 = vmatprep.subr.bf16.mxu1 %v1419_v51 }
  0x6c   :  { %v146_v43 = vrot.slane %v1889_v40, %v145_v39  ;;  %v154_v44 = vrot.slane %v1889_v40, %v153_v0  ;;  %v150_v45 = vrot.slane %v1889_v40, %v149_v41  ;;  %v158_v47 = vrot.slane %v1889_v40, %v157_v42  ;;  %v1683_v39 = vld [vmem:[#allocation8 + $0x188] sm:$0xff]   ;;  %v1684_v0 = vld [vmem:[#allocation8 + $0x140] sm:$0xff]  }
  0x6d   :  { %v1685_v42 = vld [vmem:[#allocation8 + $0x1c0] sm:$0xff]  }
  0x6e   :  { %596 = vmatpush1.bf16.msra.mxu0 %v1416_v52  ;;  %637 = vmatpush1.bf16.msra.mxu1 %v1418_v55 }
  0x6f   :  { %597 = vmatprep.subr.bf16.mxu0 %v1409_v56  ;;  %638 = vmatprep.subr.bf16.mxu1 %v1411_v59 }
  0x72   :  { %598 = vmatpush1.bf16.msra.mxu0 %v1408_v60  ;;  %639 = vmatpush1.bf16.msra.mxu1 %v1410_v61 }
  0x73   :  { %599 = vmatprep.subr.bf16.mxu0 %v1401_v62  ;;  %640 = vmatprep.subr.bf16.mxu1 %v1403_v63 }
  0x76   :  { %600 = vmatpush1.bf16.msra.mxu0 %v1400_v2  ;;  %641 = vmatpush1.bf16.msra.mxu1 %v1402_v4  ;;  %v1658_v2 = vld [vmem:[#allocation8 + $0x138] sm:$0xff]  }
  0x77   :  { %1525 = vmatprep.subr.bf16.mxu0 %v1624_v1  ;;  %1547 = vmatprep.subr.bf16.mxu1 %v1625_v3 }
  0x79   :  { %618 = vmatmul.mubr.bf16.vlgmr.msra.gmra.mxu0 %v1878_v9  ;;  %659 = vmatmul.mubr.bf16.vlgmr.msra.gmra.mxu1 %v1878_v9  ;;  %v1641_v9 = vld [vmem:[#allocation8 + $0xd8] sm:$0xff]  }
  0x7a   :  { %1526 = vmatpush3.bf16.msra.mxu0 %v1626_v5  ;;  %1548 = vmatpush3.bf16.msra.mxu1 %v1627_v6  ;;  %v1659_v5 = vld [vmem:[#allocation8 + $0x1b8] sm:$0xff]   ;;  %v1660_v6 = vld [vmem:[#allocation8 + $0x170] sm:$0xff]  }
  0x7b   :  { %1527 = vmatprep.subr.bf16.mxu0 %v1628_v7  ;;  %1549 = vmatprep.subr.bf16.mxu1 %v1629_v8  ;;  %v1661_v7 = vld [vmem:[#allocation8 + $0x1f0] sm:$0xff]  }
  0x7c   :  { %v1662_v8 = vld [vmem:[#allocation8 + $0x130] sm:$0xff]  }
  0x7e   :  { %1528 = vmatpush3.bf16.msra.mxu0 %v1630_v10  ;;  %1550 = vmatpush3.bf16.msra.mxu1 %v1631_v11  ;;  %v1663_v10 = vld [vmem:[#allocation8 + $0x1b0] sm:$0xff]   ;;  %v1664_v11 = vld [vmem:[#allocation8 + $0x168] sm:$0xff]  }
  0x7f   :  { %1529 = vmatprep.subr.bf16.mxu0 %v1632_v12  ;;  %1551 = vmatprep.subr.bf16.mxu1 %v1633_v13  ;;  %v1665_v12 = vld [vmem:[#allocation8 + $0x1e8] sm:$0xff]  }
  0x80   :  { %v1666_v13 = vld [vmem:[#allocation8 + $0x128] sm:$0xff]  }
  0x82   :  { %1530 = vmatpush3.bf16.msra.mxu0 %v1634_v14  ;;  %1552 = vmatpush3.bf16.msra.mxu1 %v1635_v15  ;;  %v1667_v14 = vld [vmem:[#allocation8 + $0x1a8] sm:$0xff]   ;;  %v1668_v15 = vld [vmem:[#allocation8 + $0x160] sm:$0xff]  }
  0x83   :  { %1531 = vmatprep.subr.bf16.mxu0 %v1636_v16  ;;  %1553 = vmatprep.subr.bf16.mxu1 %v1637_v17  ;;  %v1669_v16 = vld [vmem:[#allocation8 + $0x1e0] sm:$0xff]  }
  0x84   :  { %v1670_v17 = vld [vmem:[#allocation8 + $0x120] sm:$0xff]  }
  0x86   :  { %1532 = vmatpush3.bf16.msra.mxu0 %v1638_v18  ;;  %1554 = vmatpush3.bf16.msra.mxu1 %v1639_v19  ;;  %v1671_v18 = vld [vmem:[#allocation8 + $0x1a0] sm:$0xff]   ;;  %v1672_v19 = vld [vmem:[#allocation8 + $0x158] sm:$0xff]  }
  0x87   :  { %1533 = vmatprep.subr.bf16.mxu0 %v1640_v20  ;;  %1555 = vmatprep.subr.bf16.mxu1 %v1641_v9  ;;  %v1673_v20 = vld [vmem:[#allocation8 + $0x1d8] sm:$0xff]  }
  0x88   :  { %v1674_v9 = vld [vmem:[#allocation8 + $0x118] sm:$0xff]  }
  0x8a   :  { %1534 = vmatpush3.bf16.msra.mxu0 %v1642_v21  ;;  %1556 = vmatpush3.bf16.msra.mxu1 %v1643_v22  ;;  %v1675_v21 = vld [vmem:[#allocation8 + $0x198] sm:$0xff]   ;;  %v1676_v22 = vld [vmem:[#allocation8 + $0x150] sm:$0xff]  }
  0x8b   :  { %1535 = vmatprep.subr.bf16.mxu0 %v1644_v23  ;;  %1557 = vmatprep.subr.bf16.mxu1 %v1645_v24  ;;  %v1677_v23 = vld [vmem:[#allocation8 + $0x1d0] sm:$0xff]   ;;  %v161_v24 = vsub.s32 4, %v1886_v38 }
  0x8e   :  { %1536 = vmatpush3.bf16.msra.mxu0 %v1646_v25  ;;  %1558 = vmatpush3.bf16.msra.mxu1 %v1647_v26  ;;  %v169_v25 = vsub.s32 6, %v1886_v38  ;;  %v1678_v26 = vld [vmem:[#allocation8 + $0x110] sm:$0xff]  }
  0x8f   :  { %1537 = vmatprep.subr.bf16.mxu0 %v1648_v27  ;;  %1559 = vmatprep.subr.bf16.mxu1 %v1649_v28  ;;  %v165_v27 = vsub.s32 5, %v1886_v38  ;;  %v1679_v28 = vld [vmem:[#allocation8 + $0x190] sm:$0xff]  }
  0x92   :  { %1538 = vmatpush3.bf16.msra.mxu0 %v1650_v29  ;;  %1560 = vmatpush3.bf16.msra.mxu1 %v1651_v30  ;;  %v173_v29 = vsub.s32 7, %v1886_v38  ;;  %v1680_v30 = vld [vmem:[#allocation8 + $0x148] sm:$0xff]  }
  0x93   :  { %1539 = vmatprep.subr.bf16.mxu0 %v1652_v31  ;;  %1561 = vmatprep.subr.bf16.mxu1 %v1653_v32  ;;  %v162_v31 = vrot.slane %v1889_v40, %v161_v24  ;;  %v1681_v32 = vld [vmem:[#allocation8 + $0x1c8] sm:$0xff]  }
  0x94   :  { %v174_v37 = vrot.slane %v1889_v40, %v173_v29 }
  0x96   :  { %1540 = vmatpush3.bf16.msra.mxu0 %v1654_v33  ;;  %1562 = vmatpush3.bf16.msra.mxu1 %v1655_v34  ;;  %v170_v33 = vrot.slane %v1889_v40, %v169_v25  ;;  %v166_v34 = vrot.slane %v1889_v40, %v165_v27  ;;  %v1687_v40 = vld [vmem:[#allocation8 + $0x180] sm:$0xff]  }
  0x97   :  { %1569 = vmatprep.subr.bf16.mxu0 %v1656_v35  ;;  %1591 = vmatprep.subr.bf16.mxu1 %v1657_v36  ;;  %v1682_v35 = vld [vmem:[#allocation8 + $0x108] sm:$0xff]  }
 0x119   :  { %v537_v46 = vpop.f32.mrf.mxu0  ;;  %v578_v49 = vpop.f32.mrf.mxu1 }
 0x11a   :  { %v538_v48 = vadd.f32 %v537_v46, %v146_v43  ;;  %v579_v50 = vadd.f32 %v578_v49, %v154_v44 }
 0x11b   :  { %v539_v51 = vpop.f32.mrf.mxu0  ;;  %v580_v53 = vpop.f32.mrf.mxu1 }
 0x11c   :  { %v540_v52 = vadd.f32 %v539_v51, %v150_v45  ;;  %v667_v54 = vmax.f32 %v538_v48, 0.0  ;;  %v669_v55 = vmax.f32 %v579_v50, 0.0  ;;  %v581_v56 = vadd.f32 %v580_v53, %v158_v47  ;;  %v1686_v47 = vld [vmem:[#allocation8 + $0x100] sm:$0xff]  }
 0x11d   :  { %v541_v57 = vpop.f32.mrf.mxu0  ;;  %v582_v59 = vpop.f32.mrf.mxu1 }
 0x11e   :  { %v668_v58 = vmax.f32 %v540_v52, 0.0  ;;  %v670_v60 = vmax.f32 %v581_v56, 0.0  ;;  %v677_v62 = vpack.c.bf16 %v669_v55, %v669_v55  ;;  %v675_v3 = vpack.c.bf16 %v667_v54, %v667_v54 }
 0x11f   :  { %v542_v61 = vpop.f32.mrf.mxu0  ;;  %v583_v1 = vpop.f32.mrf.mxu1 }
 0x120   :  { %v676_v63 = vpack.c.bf16 %v668_v58, %v668_v58  ;;  %v678_v4 = vpack.c.bf16 %v670_v60, %v670_v60 }
 0x122   :  { %1234 = vmatprep.mubr.bf16.mxu0 %v676_v63  ;;  %1274 = vmatprep.mubr.bf16.mxu1 %v678_v4 }
 0x123   :  { %1235 = vmatmul.mubr.bf16.vlgmr.msra.gmra.mxu0 %v675_v3  ;;  %1275 = vmatmul.mubr.bf16.vlgmr.msra.gmra.mxu1 %v677_v62 }
 0x124   :  { %1570 = vmatpush3.bf16.msra.mxu0 %v1658_v2  ;;  %1592 = vmatpush3.bf16.msra.mxu1 %v1659_v5 }
 0x125   :  { %1571 = vmatprep.subr.bf16.mxu0 %v1660_v6  ;;  %1593 = vmatprep.subr.bf16.mxu1 %v1661_v7  ;;  %v1460_v7 = vld [vmem:[%s1919_s4] ss:$0 sm:$0xff]  ;;  %s1768_s4 = scalar_lea.vmem %s1372_s20, 128 }
 0x126   :  { %p1769_p6 = scmp.ne.s32.totalorder %s1372_s20, %s1768_s4  ;;  %p1774_p8 = scmp.lt.s32.totalorder %s1768_s4, %s1768_s4 }
 0x128   :  { %1572 = vmatpush3.bf16.msra.mxu0 %v1662_v8  ;;  %1594 = vmatpush3.bf16.msra.mxu1 %v1663_v10  ;;  %p1775_p9 = por %p1774_p8, %p1773_p7 }
 0x129   :  { %1573 = vmatprep.subr.bf16.mxu0 %v1664_v11  ;;  %1595 = vmatprep.subr.bf16.mxu1 %v1665_v12 }
 0x12a   :  { %p1776_p10 = pnand %p1775_p9, %p1769_p6 }
 0x12c   :  { %1574 = vmatpush3.bf16.msra.mxu0 %v1666_v13  ;;  %1596 = vmatpush3.bf16.msra.mxu1 %v1667_v14 }
 0x12d   :  { %1575 = vmatprep.subr.bf16.mxu0 %v1668_v15  ;;  %1597 = vmatprep.subr.bf16.mxu1 %v1669_v16 }
 0x130   :  { %1576 = vmatpush3.bf16.msra.mxu0 %v1670_v17  ;;  %1598 = vmatpush3.bf16.msra.mxu1 %v1671_v18 }
 0x131   :  { %1577 = vmatprep.subr.bf16.mxu0 %v1672_v19  ;;  %1599 = vmatprep.subr.bf16.mxu1 %v1673_v20 }
 0x134   :  { %1578 = vmatpush3.bf16.msra.mxu0 %v1674_v9  ;;  %1600 = vmatpush3.bf16.msra.mxu1 %v1675_v21 }
 0x135   :  { %1579 = vmatprep.subr.bf16.mxu0 %v1676_v22  ;;  %1601 = vmatprep.subr.bf16.mxu1 %v1677_v23 }
 0x138   :  { %1580 = vmatpush3.bf16.msra.mxu0 %v1678_v26  ;;  %1602 = vmatpush3.bf16.msra.mxu1 %v1679_v28 }
 0x139   :  { %v619_v36 = vpop.f32.mrf.mxu0  ;;  %1581 = vmatprep.subr.bf16.mxu0 %v1680_v30  ;;  %v660_v38 = vpop.f32.mrf.mxu1  ;;  %1603 = vmatprep.subr.bf16.mxu1 %v1681_v32 }
 0x13a   :  { %v620_v41 = vadd.f32 %v619_v36, %v162_v31  ;;  %v661_v43 = vadd.f32 %v660_v38, %v170_v33 }
 0x13b   :  { %v621_v44 = vpop.f32.mrf.mxu0  ;;  %v662_v46 = vpop.f32.mrf.mxu1 }
 0x13c   :  { %v622_v45 = vadd.f32 %v621_v44, %v166_v34  ;;  %1582 = vmatpush3.bf16.msra.mxu0 %v1682_v35  ;;  %v671_v48 = vmax.f32 %v620_v41, 0.0  ;;  %v673_v49 = vmax.f32 %v661_v43, 0.0  ;;  %v663_v50 = vadd.f32 %v662_v46, %v174_v37  ;;  %1604 = vmatpush3.bf16.msra.mxu1 %v1683_v39 }
 0x13d   :  { %v623_v51 = vpop.f32.mrf.mxu0  ;;  %1583 = vmatprep.subr.bf16.mxu0 %v1684_v0  ;;  %v664_v53 = vpop.f32.mrf.mxu1  ;;  %1605 = vmatprep.subr.bf16.mxu1 %v1685_v42 }
 0x13e   :  { %v672_v52 = vmax.f32 %v622_v45, 0.0  ;;  %v674_v54 = vmax.f32 %v663_v50, 0.0  ;;  %v681_v56 = vpack.c.bf16 %v673_v49, %v673_v49  ;;  %v679_v59 = vpack.c.bf16 %v671_v48, %v671_v48 }
 0x13f   :  { %v624_v55 = vpop.f32.mrf.mxu0  ;;  %v665_v58 = vpop.f32.mrf.mxu1 }
 0x140   :  { %v680_v57 = vpack.c.bf16 %v672_v52, %v672_v52  ;;  %1584 = vmatpush3.bf16.msra.mxu0 %v1686_v47  ;;  %v682_v60 = vpack.c.bf16 %v674_v54, %v674_v54  ;;  %1606 = vmatpush3.bf16.msra.mxu1 %v1687_v40 }
 0x142   :  { %1314 = vmatprep.mubr.bf16.mxu0 %v680_v57  ;;  %1354 = vmatprep.mubr.bf16.mxu1 %v682_v60 }
 0x143   :  { %1315 = vmatmul.mubr.bf16.vlgmr.msra.gmra.mxu0 %v679_v59  ;;  %1355 = vmatmul.mubr.bf16.vlgmr.msra.gmra.mxu1 %v681_v56 }
 0x1e3   :  { %v1541_v61 = vpop.f32.mrf.mxu0  ;;  %v1563_v62 = vpop.f32.mrf.mxu1 }
 0x1e5   :  { %v1542_v63 = vpop.f32.mrf.mxu0  ;;  %v1564_v1 = vpop.f32.mrf.mxu1 }
 0x1e6   :  { %v1543_v6 = vadd.f32 %v1542_v63, %v1541_v61  ;;  %v1565_v11 = vadd.f32 %v1564_v1, %v1563_v62 }
 0x1e7   :  { %v1544_v2 = vpop.f32.mrf.mxu0  ;;  %v1566_v3 = vpop.f32.mrf.mxu1 }
 0x1e8   :  { %v1237_v8 = vadd.f32 %v1543_v6, %v1460_v7 }
 0x1e9   :  { %v1545_v4 = vpop.f32.mrf.mxu0  ;;  %v1567_v5 = vpop.f32.mrf.mxu1 }
 0x1ea   :  { %v1277_v14 = vadd.f32 %v1565_v11, %v1237_v8 }
 0x203   :  { %v1585_v10 = vpop.f32.mrf.mxu0  ;;  %v1607_v12 = vpop.f32.mrf.mxu1 }
 0x205   :  { %v1586_v13 = vpop.f32.mrf.mxu0  ;;  %v1608_v16 = vpop.f32.mrf.mxu1 }
 0x206   :  { %v1587_v15 = vadd.f32 %v1586_v13, %v1585_v10  ;;  %v1609_v19 = vadd.f32 %v1608_v16, %v1607_v12 }
 0x207   :  { %v1588_v17 = vpop.f32.mrf.mxu0  ;;  %v1610_v20 = vpop.f32.mrf.mxu1 }
 0x208   :  { %v1317_v18 = vadd.f32 %v1587_v15, %v1277_v14 }
 0x209   :  { %v1589_v9 = vpop.f32.mrf.mxu0  ;;  %v1611_v22 = vpop.f32.mrf.mxu1 }
 0x20a   :  { %v1357_v21 = vadd.f32 %v1609_v19, %v1317_v18 }
 0x20c   :  { %1362 = vst [vmem:[#allocation10] sm:$0xff] %v1357_v21  ;;  %v1363_v23 = vmax.f32 %v1357_v21, 0.0 }
 0x20d   :  { %1779 = shalt.err (!%p1776_p10)
}
 0x20e   :  { %1374 = dma.vmem_to_hbm [thread:$0]  %s1372_s20, 128, %s1920_s5, [#allocation4]   ;;  %1364 = vst [vmem:[#allocation11] sm:$0xff] %v1363_v23 }
 0x20f   :  { %s1788_s25 = scalar_lea.vmem %s1382_s22, 128  ;;  %p1793_p12 = scmp.lt.s32.totalorder %s1382_s22, %s1382_s22 }
 0x210   :  { %p1789_p11 = scmp.ne.s32.totalorder %s1382_s22, %s1788_s25  ;;  %p1794_p13 = scmp.lt.s32.totalorder %s1788_s25, %s1788_s25 }
 0x212   :  { %p1795_p0 = por %p1794_p13, %p1793_p12 }
 0x214   :  { %p1796_p1 = pnand %p1795_p0, %p1789_p11 }
 0x216   :  { %1799 = shalt.err (!%p1796_p1)
}
 0x217   :  { %1384 = dma.vmem_to_hbm [thread:$0]  %s1382_s22, 128, %s1921_s6, [#allocation12]  }
 0x218   :  { %1814 = dma.done.wait [#allocation4], 128  }
 0x219   :  { %1815 = vsyncadd [#allocation4], 4294967168 }
 0x21a   :  { %1816 = dma.done.wait [#allocation12], 128  }
 0x21b   :  { %1817 = vsyncadd [#allocation12], 4294967168 }
 0x21c   :  { %1391 = vsyncpa [#allocation3], 1 }
 0x21d   :  { %1392 = vsyncpa [#allocation6], 1 }
 0x21e   :  { %1393 = vsyncpa [#allocation9], 1 }
 0x21f   :  { %1394 = vsyncpa [#allocation4], 1 }
 0x220   :  { %1395 = vsyncpa [#allocation12], 1 }

</bundles_post_ra>
